<compile_context>
chip_gen: v7x
topology: tpu7x:2x2x1
jax: 0.10.0
libtpu: 0.0.40
codegen_flags: <defaults>
</compile_context>

<pallas_src>
import functools

import jax
import jax.numpy as jnp
from jax.experimental import pallas as pl
from jax.experimental.pallas import tpu as pltpu


def _ratio_mlp_kernel(z_ref, w1t_ref, b1_ref, w2t_ref, b2_ref, w3t_ref, out_ref):
    # z_ref: (K, TN) — each lane (column) is one (theta, x) pair.
    # Transposed weights: w1t (H, K), w2t (H, H), w3t (1, H); biases (H, 1).
    h1 = jnp.dot(w1t_ref[...], z_ref[...],
                 preferred_element_type=jnp.float32) + b1_ref[...]
    h1 = jnp.maximum(h1, 0.0)
    h2 = jnp.dot(w2t_ref[...], h1,
                 preferred_element_type=jnp.float32) + b2_ref[...]
    h2 = jnp.maximum(h2, 0.0)
    out_ref[...] = jnp.dot(w3t_ref[...], h2,
                           preferred_element_type=jnp.float32).astype(out_ref.dtype)


@functools.partial(jax.jit, static_argnames=("tn",))
def ratio_estimator_forward(theta, x, params, tn=512):
    """Pallas implementation of RatioEstimator.unnormalized_log_ratio.

    theta: (S, B, D_theta), x: (S, B, D_x)  ->  (S, B) log-ratios.
    `tn` is the lane tile over N = S*B; must be a multiple of 128.
    """
    S, B, Dt = theta.shape
    Sx, Bx, Dx = x.shape
    assert (S, B) == (Sx, Bx), "batch prefixes of theta and x must agree"

    N = S * B
    K = Dt + Dx

    w1, b1, w2, b2, w3, b3 = params
    H = w2.shape[0]

    # combine_theta_and_x + transpose to columns-as-samples (one cheap reshuffle;
    # feature dims are tiny). No padding, no dtype upcast.
    z = jnp.concatenate([theta.reshape(N, Dt), x.reshape(N, Dx)], axis=-1).T  # (K, N)

    # Transposed weights / column biases (tiny, one-time).
    w1t = w1.T                 # (H, K)
    w2t = w2.T                 # (H, H)
    w3t = w3.T                 # (1, H)
    b1c = b1.reshape(H, 1)
    b2c = b2.reshape(H, 1)

    # Lane tile: full array if N is small (block == full dim is always legal),
    # otherwise a 128-multiple tile; partial boundary block handled by Pallas.
    tn_eff = tn if N >= tn else N
    grid = (pl.cdiv(N, tn_eff),)

    def full_spec(r, c):
        return pl.BlockSpec((r, c), lambda i: (0, 0))

    out = pl.pallas_call(
        _ratio_mlp_kernel,
        out_shape=jax.ShapeDtypeStruct((1, N), jnp.float32),
        grid_spec=pltpu.PrefetchScalarGridSpec(
            num_scalar_prefetch=0,
            grid=grid,
            in_specs=[
                pl.BlockSpec((K, tn_eff), lambda i: (0, i)),   # z column tile
                full_spec(H, K),      # W1^T  (resident: constant block index)
                full_spec(H, 1),      # b1
                full_spec(H, H),      # W2^T
                full_spec(H, 1),      # b2
                full_spec(1, H),      # W3^T
            ],
            out_specs=pl.BlockSpec((1, tn_eff), lambda i: (0, i)),  # lane-dense
        ),
        compiler_params=pltpu.CompilerParams(
            dimension_semantics=("parallel",)),
    )(z, w1t, b1c, w2t, b2c, w3t)

    # Final bias folded here (scalar), squeeze(-1) and restore (S, B).
    return (out[0] + b3.reshape(())).reshape(S, B)


def _reference_forward(theta, x, params):
    """Pure-JAX reference mirroring the PyTorch semantics."""
    S, B, Dt = theta.shape
    Dx = x.shape[-1]
    w1, b1, w2, b2, w3, b3 = params
    z = jnp.concatenate(
        [theta.reshape(-1, Dt), x.reshape(-1, Dx)], axis=-1)      # combine_theta_and_x
    h1 = jnp.maximum(z @ w1 + b1, 0.0)
    h2 = jnp.maximum(h1 @ w2 + b2, 0.0)
    out = h2 @ w3 + b3                                            # net(z)
    return out.squeeze(-1).reshape(S, B)                          # .squeeze(-1)


def _init_params(key, d_theta, d_x, hidden):
    ks = jax.random.split(key, 6)
    k_in = d_theta + d_x
    scale1 = 1.0 / jnp.sqrt(k_in)
    scale2 = 1.0 / jnp.sqrt(hidden)
    w1 = jax.random.normal(ks[0], (k_in, hidden), jnp.float32) * scale1
    b1 = jax.random.normal(ks[1], (1, hidden), jnp.float32) * 0.01
    w2 = jax.random.normal(ks[2], (hidden, hidden), jnp.float32) * scale2
    b2 = jax.random.normal(ks[3], (1, hidden), jnp.float32) * 0.01
    w3 = jax.random.normal(ks[4], (hidden, 1), jnp.float32) * scale2
    b3 = jax.random.normal(ks[5], (1, 1), jnp.float32) * 0.01
    return (w1, b1, w2, b2, w3, b3)


if __name__ == "__main__":
    key = jax.random.PRNGKey(0)
    k_theta, k_x, k_params, k_theta2, k_x2 = jax.random.split(key, 5)

    # sample_dim=2, batch_dim=8, theta_shape=(3,), x_shape=(5,), hidden=32
    S, B, D_THETA, D_X, HIDDEN = 2, 8, 3, 5, 32
    params = _init_params(k_params, D_THETA, D_X, HIDDEN)

    theta = jax.random.normal(k_theta, (S, B, D_THETA), jnp.float32)
    x = jax.random.normal(k_x, (S, B, D_X), jnp.float32)

    out = ratio_estimator_forward(theta, x, params)
    out = jax.block_until_ready(out)
    ref = _reference_forward(theta, x, params)
    assert out.shape == (S, B), out.shape
    assert jnp.allclose(out, ref, atol=1e-4, rtol=1e-4)

    # Second, larger case exercising the tiled path with a partial boundary
    # block (N = 640, TN = 512 -> grid of 2, last block 128 valid lanes).
    S2, B2 = 4, 160
    theta2 = jax.random.normal(k_theta2, (S2, B2, D_THETA), jnp.float32)
    x2 = jax.random.normal(k_x2, (S2, B2, D_X), jnp.float32)
    out2 = jax.block_until_ready(ratio_estimator_forward(theta2, x2, params))
    ref2 = _reference_forward(theta2, x2, params)
    assert out2.shape == (S2, B2), out2.shape
    assert jnp.allclose(out2, ref2, atol=1e-4, rtol=1e-4)

    print("KERNEL_OK")
</pallas_src>

<mosaic_0001>
module attributes {stable_mosaic.version = 11 : i64} {
  func.func @_ratio_mlp_kernel(%arg0: i32, %arg1: memref<8x16xf32, #tpu.memory_space<vmem>>, %arg2: memref<32x8xf32, #tpu.memory_space<vmem>>, %arg3: memref<32x1xf32, #tpu.memory_space<vmem>>, %arg4: memref<32x32xf32, #tpu.memory_space<vmem>>, %arg5: memref<32x1xf32, #tpu.memory_space<vmem>>, %arg6: memref<1x32xf32, #tpu.memory_space<vmem>>, %arg7: memref<1x16xf32, #tpu.memory_space<vmem>>) attributes {dimension_semantics = [#tpu.dimension_semantics<parallel>], iteration_bounds = array<i64: 1>, scalar_prefetch = 0 : i64, scratch_operands = 0 : i64, tpu.core_type = #tpu.core_type<tc>, window_params = [{transform_indices = @transform_0, window_bounds = array<i64: 8, 16>}, {pipeline_mode = #tpu.pipeline_mode<synchronous>, transform_indices = @transform_1, window_bounds = array<i64: 32, 8>}, {pipeline_mode = #tpu.pipeline_mode<synchronous>, transform_indices = @transform_2, window_bounds = array<i64: 32, 1>}, {pipeline_mode = #tpu.pipeline_mode<synchronous>, transform_indices = @transform_3, window_bounds = array<i64: 32, 32>}, {pipeline_mode = #tpu.pipeline_mode<synchronous>, transform_indices = @transform_4, window_bounds = array<i64: 32, 1>}, {pipeline_mode = #tpu.pipeline_mode<synchronous>, transform_indices = @transform_5, window_bounds = array<i64: 1, 32>}, {transform_indices = @transform_6, window_bounds = array<i64: 1, 16>}]} {
    %c0 = arith.constant 0 : index
    %c0_0 = arith.constant 0 : index
    %0 = vector.load %arg2[%c0, %c0_0] : memref<32x8xf32, #tpu.memory_space<vmem>>, vector<32x8xf32>
    %c0_1 = arith.constant 0 : index
    %c0_2 = arith.constant 0 : index
    %1 = vector.load %arg1[%c0_1, %c0_2] : memref<8x16xf32, #tpu.memory_space<vmem>>, vector<8x16xf32>
    %cst = arith.constant dense<0.000000e+00> : vector<32x16xf32>
    %2 = tpu.matmul %0, %1, %cst {dimension_numbers = #tpu.dot_dimension_numbers<[1], [0], [0], [1], [0, 0, 1, 1], [], []>} : vector<32x8xf32>, vector<8x16xf32>, vector<32x16xf32> -> vector<32x16xf32>
    %c0_3 = arith.constant 0 : index
    %c0_4 = arith.constant 0 : index
    %3 = vector.load %arg3[%c0_3, %c0_4] : memref<32x1xf32, #tpu.memory_space<vmem>>, vector<32x1xf32>
    %4 = vector.broadcast %3 : vector<32x1xf32> to vector<32x16xf32>
    %5 = arith.addf %2, %4 : vector<32x16xf32>
    %cst_5 = arith.constant 0.000000e+00 : f32
    %6 = vector.broadcast %cst_5 : f32 to vector<32x16xf32>
    %7 = arith.maximumf %5, %6 : vector<32x16xf32>
    %c0_6 = arith.constant 0 : index
    %c0_7 = arith.constant 0 : index
    %8 = vector.load %arg4[%c0_6, %c0_7] : memref<32x32xf32, #tpu.memory_space<vmem>>, vector<32x32xf32>
    %cst_8 = arith.constant dense<0.000000e+00> : vector<32x16xf32>
    %9 = tpu.matmul %8, %7, %cst_8 {dimension_numbers = #tpu.dot_dimension_numbers<[1], [0], [0], [1], [0, 0, 1, 1], [], []>} : vector<32x32xf32>, vector<32x16xf32>, vector<32x16xf32> -> vector<32x16xf32>
    %c0_9 = arith.constant 0 : index
    %c0_10 = arith.constant 0 : index
    %10 = vector.load %arg5[%c0_9, %c0_10] : memref<32x1xf32, #tpu.memory_space<vmem>>, vector<32x1xf32>
    %11 = vector.broadcast %10 : vector<32x1xf32> to vector<32x16xf32>
    %12 = arith.addf %9, %11 : vector<32x16xf32>
    %cst_11 = arith.constant 0.000000e+00 : f32
    %13 = vector.broadcast %cst_11 : f32 to vector<32x16xf32>
    %14 = arith.maximumf %12, %13 : vector<32x16xf32>
    %c0_12 = arith.constant 0 : index
    %c0_13 = arith.constant 0 : index
    %15 = vector.load %arg6[%c0_12, %c0_13] : memref<1x32xf32, #tpu.memory_space<vmem>>, vector<1x32xf32>
    %cst_14 = arith.constant dense<0.000000e+00> : vector<1x16xf32>
    %16 = tpu.matmul %15, %14, %cst_14 {dimension_numbers = #tpu.dot_dimension_numbers<[1], [0], [0], [1], [0, 0, 1, 1], [], []>} : vector<1x32xf32>, vector<32x16xf32>, vector<1x16xf32> -> vector<1x16xf32>
    %c0_15 = arith.constant 0 : index
    %c0_16 = arith.constant 0 : index
    %17 = vector.load %arg7[%c0_15, %c0_16] : memref<1x16xf32, #tpu.memory_space<vmem>>, vector<1x16xf32>
    tpu.vector_store %arg7[%c0_15, %c0_16], %16 {strides = array<i32>} : memref<1x16xf32, #tpu.memory_space<vmem>>, vector<1x16xf32>,
    return
  }
  func.func @transform_0(%arg0: i32) -> (i32, i32) {
    %c0_i32 = arith.constant 0 : i32
    %c0_i32_0 = arith.constant 0 : i32
    return %c0_i32, %arg0 : i32, i32
  }
  func.func @transform_1(%arg0: i32) -> (i32, i32) {
    %c0_i32 = arith.constant 0 : i32
    %c0_i32_0 = arith.constant 0 : i32
    %c0_i32_1 = arith.constant 0 : i32
    return %c0_i32, %c0_i32_0 : i32, i32
  }
  func.func @transform_2(%arg0: i32) -> (i32, i32) {
    %c0_i32 = arith.constant 0 : i32
    %c0_i32_0 = arith.constant 0 : i32
    %c0_i32_1 = arith.constant 0 : i32
    return %c0_i32, %c0_i32_0 : i32, i32
  }
  func.func @transform_3(%arg0: i32) -> (i32, i32) {
    %c0_i32 = arith.constant 0 : i32
    %c0_i32_0 = arith.constant 0 : i32
    %c0_i32_1 = arith.constant 0 : i32
    return %c0_i32, %c0_i32_0 : i32, i32
  }
  func.func @transform_4(%arg0: i32) -> (i32, i32) {
    %c0_i32 = arith.constant 0 : i32
    %c0_i32_0 = arith.constant 0 : i32
    %c0_i32_1 = arith.constant 0 : i32
    return %c0_i32, %c0_i32_0 : i32, i32
  }
  func.func @transform_5(%arg0: i32) -> (i32, i32) {
    %c0_i32 = arith.constant 0 : i32
    %c0_i32_0 = arith.constant 0 : i32
    %c0_i32_1 = arith.constant 0 : i32
    return %c0_i32, %c0_i32_0 : i32, i32
  }
  func.func @transform_6(%arg0: i32) -> (i32, i32) {
    %c0_i32 = arith.constant 0 : i32
    %c0_i32_0 = arith.constant 0 : i32
    return %c0_i32, %arg0 : i32, i32
  }
}

</mosaic_0001>

<bundles_post_ra>
// kernel: ratio_estimator_forward.1
= control target key start
LH: loop header
LB: loop body
LE: loop exit
PB: predicated region body
PF: predicated region fallthrough
CT: control target
= control target key end

     0   :  { %vm52_vm0 = vcmask 64512   ;;  %v444_v3 = vmov 0   ;;  %vm182_vm1 = vcmask 261120   ;;  %v445_v36 = vmov 0.0|0.0   ;;  %s549_s0 = inlined_call_operand.vmem [shape: f32[8,16], index: 0, kind: input, shape index: {}]   ;;  %s550_s1 = inlined_call_operand.vmem [shape: f32[32,8], index: 1, kind: input, shape index: {}]   ;;  %s551_s2 = inlined_call_operand.vmem [shape: f32[32,1], index: 2, kind: input, shape index: {}]   ;;  %s552_s4 = inlined_call_operand.vmem [shape: f32[32,1], index: 4, kind: input, shape index: {}]   ;;  %s553_s3 = inlined_call_operand.vmem [shape: f32[32,32], index: 3, kind: input, shape index: {}]   ;;  %s554_s5 = inlined_call_operand.vmem [shape: f32[1,32], index: 5, kind: input, shape index: {}]   ;;  %s555_s6 = inlined_call_operand.vmem [shape: f32[1,16], index: 6, kind: output, shape index: {}]  }
   0x1   :  { %v27_v0 = vld [vmem:[%s549_s0] sm:$0xff]  ;;  %v24_v2 = vld [vmem:[%s550_s1 + $0x8] sm:$0xff]  ;;  %442 = vset.pattern.permute.xlu0 %v444_v3  ;;  %443 = vset.pattern.permute.xlu1 %v444_v3  ;;  %v25_v4 = vld [vmem:[%s550_s1 + $0x10] sm:$0xff]  ;;  %vm446_vm2 = vmmov 0   ;;  %v447_v37 = vmov 0.0   ;;  %vm358_vm3 = vcmask 122880  }
   0x2   :  { %v23_v1 = vld [vmem:[%s550_s1] sm:$0xff]  ;;  %391 = vmatprep.subr.mxu0 %v27_v0  ;;  %v30_v6 = vld [vmem:[%s551_s2 + $0x10] sm:$0xff]  ;;  %v29_v7 = vld [vmem:[%s551_s2 + $0x8] sm:$0xff] }
   0x3   :  { %393 = vmatprep.mubr.msk.f32.mxu0 %vm52_vm0, %v23_v1  ;;  %v28_v5 = vld [vmem:[%s551_s2] sm:$0xff]  ;;  %392 = vmatpush3.msra.mxu0 %v27_v0  ;;  %v26_v8 = vld [vmem:[%s550_s1 + $0x18] sm:$0xff]  ;;  %v159_v11 = vld [vmem:[%s552_s4 + $0x8] sm:$0xff] }
   0x4   :  { %34 = vperm.xlu0 %442, %v28_v5   ;;  %394 = vmatmul.mubr.msk.f32.vlgmr.msra.gmra.mrb[0].mxu0 %vm52_vm0, %v24_v2  ;;  %v31_v9 = vld [vmem:[%s551_s2 + $0x18] sm:$0xff]  ;;  %v158_v10 = vld [vmem:[%s552_s4] sm:$0xff]  ;;  %v160_v12 = vld [vmem:[%s552_s4 + $0x10] sm:$0xff] }
   0x5   :  { %44 = vperm.xlu1 %443, %v30_v6   ;;  %396 = vmatprep.mubr.msk.f32.mxu0 %vm52_vm0, %v25_v4  ;;  %v161_v13 = vld [vmem:[%s552_s4 + $0x18] sm:$0xff]  ;;  %v154_v14 = vld [vmem:[%s553_s3] sm:$0xff]  ;;  %v155_v33 = vld [vmem:[%s553_s3 + $0x8] sm:$0xff] }
   0x6   :  { %407 = vmatprep.mubr.msk.f32.mxu1 %vm182_vm1, %v154_v14  ;;  %v156_v34 = vld [vmem:[%s553_s3 + $0x10] sm:$0xff]  ;;  %v157_v35 = vld [vmem:[%s553_s3 + $0x18] sm:$0xff]  ;;  %432 = vmatprep.subr.bf16.mxu0 %v445_v36  ;;  %v284_v56 = vld [vmem:[%s554_s5] sm:$0x1] }
   0x8   :  { %39 = vperm.xlu0 %442, %v29_v7   ;;  %397 = vmatmul.mubr.msk.f32.gmra.mrb[2].mxu0 %vm52_vm0, %v26_v8 }
   0x9   :  { %49 = vperm.xlu1 %443, %v31_v9   ;;  %421 = vmatprep.mubr.msk.f32.mxu0 %vm446_vm2, %v447_v37 }
   0xc   :  { %164 = vperm.xlu0 %442, %v158_v10  }
   0xd   :  { %169 = vperm.xlu1 %443, %v159_v11  }
  0x10   :  { %174 = vperm.xlu0 %442, %v160_v12  }
  0x11   :  { %179 = vperm.xlu1 %443, %v161_v13  }
  0x83   :  { %v35_v15 = vpop.permute.xlu0 %34 }
  0x84   :  { %v45_v16 = vpop.permute.xlu1 %44 }
  0x87   :  { %v40_v17 = vpop.permute.xlu0 %39 }
  0x88   :  { %v50_v23 = vpop.permute.xlu1 %49 }
  0x8b   :  { %v165_v39 = vpop.permute.xlu0 %164 }
  0x8c   :  { %v170_v38 = vpop.permute.xlu1 %169 }
  0x8f   :  { %v175_v48 = vpop.permute.xlu0 %174 }
  0x90   :  { %v180_v45 = vpop.permute.xlu1 %179 }
  0xd7   :  { %v395_v18 = vpop.f32.mrb[0].mxu0 }
  0xd8   :  { %v137_v19 = vadd.f32 %v395_v18, %v40_v17  ;;  %v131_v20 = vpop.f32.mrb[1].mxu0 }
  0xd9   :  { %v132_v21 = vadd.f32 %v131_v20, %v35_v15 }
  0xda   :  { %v151_v22 = vmax.f32 %v137_v19, 0.0 }
  0xdb   :  { %v150_v24 = vmax.f32 %v132_v21, 0.0  ;;  %v398_v25 = vpop.f32.mrb[2].mxu0 }
  0xdc   :  { %v147_v26 = vadd.f32 %v398_v25, %v50_v23  ;;  %v141_v27 = vpop.f32.mrb[3].mxu0 }
  0xdd   :  { %v142_v28 = vadd.f32 %v141_v27, %v45_v16  ;;  %v424_v29 = vpack.c.bf16 %v151_v22, %v150_v24 }
  0xde   :  { %v153_v30 = vmax.f32 %v147_v26, 0.0 }
  0xdf   :  { %v152_v31 = vmax.f32 %v142_v28, 0.0  ;;  %425 = vmatprep.subr.bf16.mxu1 %v424_v29 }
  0xe0   :  { %427 = vmatpush3.bf16.msra.mxu1 %v424_v29 }
  0xe1   :  { %v428_v32 = vpack.c.bf16 %v153_v30, %v152_v31 }
  0xe3   :  { %429 = vmatprep.subr.bf16.mxu1 %v428_v32 }
  0xe4   :  { %431 = vmatpush3.bf16.msra.mxu1 %v428_v32 }
  0xe7   :  { %408 = vmatmul.mubr.msk.f32.vlgmr.msra.gmra.mrb[0].mxu1 %vm182_vm1, %v155_v33 }
  0xe8   :  { %410 = vmatprep.mubr.msk.f32.mxu1 %vm182_vm1, %v156_v34 }
  0xeb   :  { %411 = vmatmul.mubr.msk.f32.gmra.mrb[2].mxu1 %vm182_vm1, %v157_v35 }
 0x1ba   :  { %v409_v40 = vpop.f32.mrb[0].mxu1 }
 0x1bb   :  { %v267_v41 = vadd.f32 %v409_v40, %v170_v38  ;;  %v261_v42 = vpop.f32.mrb[1].mxu1 }
 0x1bc   :  { %v262_v43 = vadd.f32 %v261_v42, %v165_v39 }
 0x1bd   :  { %v281_v44 = vmax.f32 %v267_v41, 0.0 }
 0x1be   :  { %v280_v46 = vmax.f32 %v262_v43, 0.0  ;;  %v412_v47 = vpop.f32.mrb[2].mxu1 }
 0x1bf   :  { %v277_v49 = vadd.f32 %v412_v47, %v180_v45  ;;  %v271_v50 = vpop.f32.mrb[3].mxu1 }
 0x1c0   :  { %v433_v51 = vpack.c.bf16 %v281_v44, %v280_v46  ;;  %v272_v52 = vadd.f32 %v271_v50, %v175_v48 }
 0x1c1   :  { %v283_v53 = vmax.f32 %v277_v49, 0.0 }
 0x1c2   :  { %v282_v54 = vmax.f32 %v272_v52, 0.0  ;;  %434 = vmatpush3.bf16.msra.mxu0 %v433_v51 }
 0x1c3   :  { %435 = vmatprep.subr.bf16.mxu0 %v445_v36 }
 0x1c4   :  { %v436_v55 = vpack.c.bf16 %v283_v53, %v282_v54 }
 0x1c6   :  { %437 = vmatpush3.bf16.msra.mxu0 %v436_v55 }
 0x1c9   :  { %422 = vmatmul.mubr.msk.f32.vlgmr.msra.gmra.mrb[4].mxu0 %vm182_vm1, %v284_v56 }
 0x29c   :  { %v354_v57 = vpop.f32.mrb[4].mxu0 }
 0x29d   :  { %359 = vst.msk [vmem:[%s555_s6] sm:$0x1] %vm358_vm3, %v354_v57  ;;  %v423_v58 = vpop.f32.mrb[5].mxu0 }

</bundles_post_ra>
